<compile_context>
chip_gen: v7x
topology: tpu7x:2x2x1
jax: 0.10.0
libtpu: 0.0.40
codegen_flags: <defaults>
</compile_context>

<pallas_src>
import jax
import jax.numpy as jnp
from jax.experimental import pallas as pl
from jax.experimental.pallas import tpu as pltpu

_HIDDEN = 64
_NEG_SLOPE = 0.2


def _encoder_z_kernel(x_ref, w1_ref, b1_ref, wh_ref, bh_ref, out_ref):
    # Feature encoder: (tb, D) @ (D, 64) + b1 -> MXU matmul, f32 accumulate.
    h = jnp.dot(x_ref[...], w1_ref[...], preferred_element_type=jnp.float32)
    h = h + b1_ref[...]
    # LeakyReLU(0.2): max(h, 0.2*h) -> 2 VALU ops (no compare+select).
    h = jnp.maximum(h, _NEG_SLOPE * h)
    # Fused mu/logvar heads: one (tb, 64) @ (64, 2L) matmul, single lane-dense store.
    out = jnp.dot(h, wh_ref[...], preferred_element_type=jnp.float32) + bh_ref[...]
    out_ref[...] = out.astype(out_ref.dtype)


def pack_params(w1, b1, w_mu, b_mu, w_lv, b_lv, *, x_dtype=jnp.float32):
    """One-time parameter preprocessing (hoisted out of the per-call wrapper).

    Returns (w1, b1_2d, w_heads, b_heads).  w1 is cast to `x_dtype` so the
    first MXU pass can run in bf16 when the bandwidth-saving path is used;
    the head weights/biases stay f32 (tiny, and post-matmul math is f32).
    """
    h = w1.shape[1]
    l = w_mu.shape[1]
    w1_p = w1.astype(x_dtype)
    b1_2d = b1.reshape(1, h).astype(jnp.float32)
    w_heads = jnp.concatenate([w_mu, w_lv], axis=1).astype(jnp.float32)        # (H, 2L)
    b_heads = jnp.concatenate([b_mu, b_lv], axis=0).reshape(1, 2 * l).astype(jnp.float32)
    return w1_p, b1_2d, w_heads, b_heads


def _round_up(n, m):
    return ((n + m - 1) // m) * m


def _vmem_bytes(tb, d, h, l2, x_itemsize):
    x_blk = 2 * tb * d * x_itemsize                         # double-buffered x tile
    out_blk = 2 * tb * l2 * 4                                # double-buffered fused output
    weights = 2 * (d * h * x_itemsize + (h + h * l2 + l2) * 4)  # resident operands (2 bufs)
    h_live = tb * h * 4                                      # f32 intermediate
    return x_blk + out_blk + weights + h_live


def _pick_batch_tile(b, d, h, l2, x_itemsize):
    # Target ~2 MiB of x per block (kernel is HBM-read-bound on x); rows are a
    # multiple of 8; cap at 1024 rows so the (tb, 64) f32 `h` doesn't spill.
    target_bytes = 2 << 20
    tb = max(8, min(1024, ((target_bytes // max(1, d * x_itemsize)) // 8) * 8))
    if tb >= b:
        # Whole batch fits in one tile.  If the batch is big enough, split in
        # two so ("parallel",) can shard across both v7x TensorCores.
        if b > 8:
            half = _round_up((b + 1) // 2, 8)
            tb = half if half < b else b
        else:
            tb = b
    # Shrink until the tile set fits a conservative scoped-VMEM budget.
    budget = 12 << 20
    while tb > 8 and _vmem_bytes(tb, d, h, l2, x_itemsize) > budget:
        tb = max(8, (tb // 2 // 8) * 8)
    return tb


def encoder_z_forward(x, packed_params, *, tb=None):
    """x: (B, D); packed_params from pack_params().

    Returns (mu, logvar), each (B, L) f32 — matching encoder_z_v5.forward.
    """
    w1, b1_2d, w_heads, b_heads = packed_params
    B, D = x.shape
    H = w1.shape[1]          # 64
    L2 = w_heads.shape[1]    # 2 * latent_size
    L = L2 // 2

    # bf16 fast path: if params were packed with x_dtype=bf16, read x as bf16 too.
    x = x.astype(w1.dtype)
    itemsize = jnp.dtype(x.dtype).itemsize

    if tb is None:
        tb = _pick_batch_tile(B, D, H, L2, itemsize)

    grid = (pl.cdiv(B, tb),)
    vmem_limit = int(min(48 << 20,
                         max(2 * _vmem_bytes(tb, D, H, L2, itemsize), 4 << 20)))

    out = pl.pallas_call(
        _encoder_z_kernel,
        out_shape=jax.ShapeDtypeStruct((B, L2), jnp.float32),
        grid_spec=pltpu.PrefetchScalarGridSpec(
            num_scalar_prefetch=0,
            grid=grid,
            in_specs=[
                # x: walk the batch axis (double-buffered DMA per tile).
                pl.BlockSpec((tb, D), lambda i: (i, 0)),
                # Weights / biases: constant block index -> stay VMEM-resident.
                pl.BlockSpec((D, H), lambda i: (0, 0)),
                pl.BlockSpec((1, H), lambda i: (0, 0)),
                pl.BlockSpec((H, L2), lambda i: (0, 0)),
                pl.BlockSpec((1, L2), lambda i: (0, 0)),
            ],
            # Single fused lane-dense output block; mu/logvar split in wrapper.
            out_specs=pl.BlockSpec((tb, L2), lambda i: (i, 0)),
        ),
        compiler_params=pltpu.CompilerParams(
            # Independent batch tiles: shard across TensorCores on v7x.
            dimension_semantics=("parallel",),
            vmem_limit_bytes=vmem_limit,
        ),
    )(x, w1, b1_2d, w_heads, b_heads)

    return out[:, :L], out[:, L:]


def init_params(key, input_dim, latent_size):
    """Mimic weights_init: xavier_uniform_(gain=0.5) weights, zero biases."""
    hidden = _HIDDEN
    k1, k2, k3 = jax.random.split(key, 3)

    def xavier(k, fan_in, fan_out):
        bound = 0.5 * jnp.sqrt(6.0 / (fan_in + fan_out))
        return jax.random.uniform(k, (fan_in, fan_out), jnp.float32, -bound, bound)

    w1 = xavier(k1, input_dim, hidden)
    b1 = jnp.zeros((hidden,), jnp.float32)
    w_mu = xavier(k2, hidden, latent_size)
    b_mu = jnp.zeros((latent_size,), jnp.float32)
    w_lv = xavier(k3, hidden, latent_size)
    b_lv = jnp.zeros((latent_size,), jnp.float32)
    return w1, b1, w_mu, b_mu, w_lv, b_lv


if __name__ == "__main__":
    B, INPUT_DIM, LATENT = 16, 32, 8   # small shapes; B=16 -> 2 grid tiles (megacore path)

    key = jax.random.PRNGKey(0)
    kx, kp = jax.random.split(key)
    x = jax.random.normal(kx, (B, INPUT_DIM), jnp.float32)
    w1, b1, w_mu, b_mu, w_lv, b_lv = init_params(kp, INPUT_DIM, LATENT)

    # One-time parameter packing (hoisted out of the per-call wrapper).
    params_f32 = pack_params(w1, b1, w_mu, b_mu, w_lv, b_lv)

    fwd = jax.jit(encoder_z_forward)
    mu, logvar = fwd(x, params_f32)
    mu = jax.block_until_ready(mu)
    logvar = jax.block_until_ready(logvar)

    # Pure-JAX reference of the same math.
    h_ref = x @ w1 + b1
    h_ref = jnp.where(h_ref >= 0, h_ref, 0.2 * h_ref)
    mu_ref = h_ref @ w_mu + b_mu
    lv_ref = h_ref @ w_lv + b_lv

    assert mu.shape == (B, LATENT) and logvar.shape == (B, LATENT)
    assert jnp.allclose(mu, mu_ref, atol=1e-5, rtol=1e-5)
    assert jnp.allclose(logvar, lv_ref, atol=1e-5, rtol=1e-5)

    # Optional bandwidth-saving bf16 input path (f32 accumulation / epilogue).
    params_bf16 = pack_params(w1, b1, w_mu, b_mu, w_lv, b_lv, x_dtype=jnp.bfloat16)
    mu_bf, lv_bf = jax.block_until_ready(fwd(x, params_bf16))
    assert jnp.allclose(mu_bf, mu_ref, atol=5e-2, rtol=5e-2)
    assert jnp.allclose(lv_bf, lv_ref, atol=5e-2, rtol=5e-2)

    print("KERNEL_OK")
</pallas_src>

<mosaic_0001>
module attributes {stable_mosaic.version = 11 : i64} {
  func.func @_encoder_z_kernel(%arg0: i32, %arg1: memref<8x32xf32, #tpu.memory_space<vmem>>, %arg2: memref<32x64xf32, #tpu.memory_space<vmem>>, %arg3: memref<1x64xf32, #tpu.memory_space<vmem>>, %arg4: memref<64x16xf32, #tpu.memory_space<vmem>>, %arg5: memref<1x16xf32, #tpu.memory_space<vmem>>, %arg6: memref<8x16xf32, #tpu.memory_space<vmem>>) attributes {dimension_semantics = [#tpu.dimension_semantics<parallel>], iteration_bounds = array<i64: 2>, scalar_prefetch = 0 : i64, scratch_operands = 0 : i64, tpu.core_type = #tpu.core_type<tc>, window_params = [{transform_indices = @transform_0, window_bounds = array<i64: 8, 32>}, {pipeline_mode = #tpu.pipeline_mode<synchronous>, transform_indices = @transform_1, window_bounds = array<i64: 32, 64>}, {pipeline_mode = #tpu.pipeline_mode<synchronous>, transform_indices = @transform_2, window_bounds = array<i64: 1, 64>}, {pipeline_mode = #tpu.pipeline_mode<synchronous>, transform_indices = @transform_3, window_bounds = array<i64: 64, 16>}, {pipeline_mode = #tpu.pipeline_mode<synchronous>, transform_indices = @transform_4, window_bounds = array<i64: 1, 16>}, {transform_indices = @transform_5, window_bounds = array<i64: 8, 16>}]} {
    %c0 = arith.constant 0 : index
    %c0_0 = arith.constant 0 : index
    %0 = vector.load %arg1[%c0, %c0_0] : memref<8x32xf32, #tpu.memory_space<vmem>>, vector<8x32xf32>
    %c0_1 = arith.constant 0 : index
    %c0_2 = arith.constant 0 : index
    %1 = vector.load %arg2[%c0_1, %c0_2] : memref<32x64xf32, #tpu.memory_space<vmem>>, vector<32x64xf32>
    %cst = arith.constant dense<0.000000e+00> : vector<8x64xf32>
    %2 = tpu.matmul %0, %1, %cst {dimension_numbers = #tpu.dot_dimension_numbers<[1], [0], [0], [1], [0, 0, 1, 1], [], []>} : vector<8x32xf32>, vector<32x64xf32>, vector<8x64xf32> -> vector<8x64xf32>
    %c0_3 = arith.constant 0 : index
    %c0_4 = arith.constant 0 : index
    %3 = vector.load %arg3[%c0_3, %c0_4] : memref<1x64xf32, #tpu.memory_space<vmem>>, vector<1x64xf32>
    %4 = vector.broadcast %3 : vector<1x64xf32> to vector<8x64xf32>
    %5 = arith.addf %2, %4 : vector<8x64xf32>
    %cst_5 = arith.constant 2.000000e-01 : f32
    %6 = vector.broadcast %cst_5 : f32 to vector<8x64xf32>
    %7 = arith.mulf %6, %5 : vector<8x64xf32>
    %8 = arith.maximumf %5, %7 : vector<8x64xf32>
    %c0_6 = arith.constant 0 : index
    %c0_7 = arith.constant 0 : index
    %9 = vector.load %arg4[%c0_6, %c0_7] : memref<64x16xf32, #tpu.memory_space<vmem>>, vector<64x16xf32>
    %cst_8 = arith.constant dense<0.000000e+00> : vector<8x16xf32>
    %10 = tpu.matmul %8, %9, %cst_8 {dimension_numbers = #tpu.dot_dimension_numbers<[1], [0], [0], [1], [0, 0, 1, 1], [], []>} : vector<8x64xf32>, vector<64x16xf32>, vector<8x16xf32> -> vector<8x16xf32>
    %c0_9 = arith.constant 0 : index
    %c0_10 = arith.constant 0 : index
    %11 = vector.load %arg5[%c0_9, %c0_10] : memref<1x16xf32, #tpu.memory_space<vmem>>, vector<1x16xf32>
    %12 = vector.broadcast %11 : vector<1x16xf32> to vector<8x16xf32>
    %13 = arith.addf %10, %12 : vector<8x16xf32>
    %c0_11 = arith.constant 0 : index
    %c0_12 = arith.constant 0 : index
    %14 = vector.load %arg6[%c0_11, %c0_12] : memref<8x16xf32, #tpu.memory_space<vmem>>, vector<8x16xf32>
    tpu.vector_store %arg6[%c0_11, %c0_12], %13 {strides = array<i32>} : memref<8x16xf32, #tpu.memory_space<vmem>>, vector<8x16xf32>,
    return
  }
  func.func @transform_0(%arg0: i32) -> (i32, i32) {
    %c0_i32 = arith.constant 0 : i32
    %c0_i32_0 = arith.constant 0 : i32
    return %arg0, %c0_i32 : i32, i32
  }
  func.func @transform_1(%arg0: i32) -> (i32, i32) {
    %c0_i32 = arith.constant 0 : i32
    %c0_i32_0 = arith.constant 0 : i32
    %c0_i32_1 = arith.constant 0 : i32
    return %c0_i32, %c0_i32_0 : i32, i32
  }
  func.func @transform_2(%arg0: i32) -> (i32, i32) {
    %c0_i32 = arith.constant 0 : i32
    %c0_i32_0 = arith.constant 0 : i32
    %c0_i32_1 = arith.constant 0 : i32
    return %c0_i32, %c0_i32_0 : i32, i32
  }
  func.func @transform_3(%arg0: i32) -> (i32, i32) {
    %c0_i32 = arith.constant 0 : i32
    %c0_i32_0 = arith.constant 0 : i32
    %c0_i32_1 = arith.constant 0 : i32
    return %c0_i32, %c0_i32_0 : i32, i32
  }
  func.func @transform_4(%arg0: i32) -> (i32, i32) {
    %c0_i32 = arith.constant 0 : i32
    %c0_i32_0 = arith.constant 0 : i32
    %c0_i32_1 = arith.constant 0 : i32
    return %c0_i32, %c0_i32_0 : i32, i32
  }
  func.func @transform_5(%arg0: i32) -> (i32, i32) {
    %c0_i32 = arith.constant 0 : i32
    %c0_i32_0 = arith.constant 0 : i32
    return %arg0, %c0_i32 : i32, i32
  }
}

</mosaic_0001>

<bundles_post_ra>
// kernel: encoder_z_forward.1
= control target key start
LH: loop header
LB: loop body
LE: loop exit
PB: predicated region body
PF: predicated region fallthrough
CT: control target
= control target key end

     0   :  { %s579_s18 = smov 0   ;;  %s641_s0 = inlined_call_operand.vmem [shape: f32[16,32], index: 0, kind: input, shape index: {}]   ;;  %s642_s1 = inlined_call_operand.vmem [shape: f32[32,64], index: 1, kind: input, shape index: {}]   ;;  %s643_s2 = inlined_call_operand.vmem [shape: f32[1,64], index: 2, kind: input, shape index: {}]   ;;  %s644_s3 = inlined_call_operand.vmem [shape: f32[64,16], index: 3, kind: input, shape index: {}]   ;;  %s645_s4 = inlined_call_operand.vmem [shape: f32[1,16], index: 4, kind: input, shape index: {}]   ;;  %s646_s5 = inlined_call_operand.vmem [shape: f32[16,16], index: 5, kind: output, shape index: {}]  }
   0x1 LB: > { %s452_s19 = sadd.s32 4294967295, %s544_s18   ;;  %p456_p0 = scmp.ge.s32.totalorder %s544_s18, 1  ;;  %s544_s18 = sphi %s579_s18, %s15_s18  }
   0x2   : > { %p186_p1 = scmp.lt.s32.totalorder %s544_s18, 3 }
   0x4   : > { %p187_p2 = pnand %p456_p0, %p186_p1 }
   0x5   : > { %v221_v0 = vld [vmem:[%s642_s1] sm:$0xff] (!%p187_p2)  ;;  %v222_v1 = vld [vmem:[%s642_s1 + $0x8] sm:$0xff] (!%p187_p2)  ;;  %v223_v2 = vld [vmem:[%s642_s1 + $0x10] sm:$0xff] (!%p187_p2)  ;;  %v546_v3 = vmov (!%p187_p2), 0.0|0.0   ;;  %vm547_vm0 = vmmov (!%p187_p2), 0   ;;  %v548_v6 = vmov (!%p187_p2), 0.0  }
   0x6   : > { %190 = sbr.rel (%p187_p2) target bundleno = 450 (0x1c2), region = 40  ;;  %509 = vmatprep.subr.bf16.mxu0 (!%p187_p2), %v546_v3  ;;  %v510_v4 = vpack.c.bf16 (!%p187_p2), %v222_v1, %v221_v0  ;;  %v224_v5 = vld [vmem:[%s642_s1 + $0x18] sm:$0xff] (!%p187_p2)  ;;  %487 = vmatprep.mubr.msk.f32.mxu0 (!%p187_p2), %vm547_vm0, %v548_v6  ;;  %p212_p3 = scmp.lt.s32.totalorder (!%p187_p2), %s452_s19, 1  ;;  %v308_v7 = vld [vmem:[%s644_s3] sm:$0xff] (!%p187_p2)  ;;  %v309_v8 = vld [vmem:[%s644_s3 + $0x8] sm:$0xff] (!%p187_p2)  ;;  %vm232_vm1 = vcmask (!%p187_p2), 261120  }
   0x7   : > { %515 = vmatprep.subr.bf16.mxu1 (!%p187_p2), %v546_v3  ;;  %v516_v9 = vpack.c.bf16 (!%p187_p2), %v309_v8, %v308_v7  ;;  %v310_v10 = vld [vmem:[%s644_s3 + $0x10] sm:$0xff] (!%p187_p2)  ;;  %v311_v11 = vld [vmem:[%s644_s3 + $0x18] sm:$0xff] (!%p187_p2)  ;;  %506 = vmatprep.mubr.msk.f32.mxu1 (!%p187_p2), %vm547_vm0, %v548_v6  ;;  %v513_v12 = vpack.c.bf16 (!%p187_p2), %v224_v5, %v223_v2  ;;  %v312_v15 = vld [vmem:[%s644_s3 + $0x20] sm:$0xff] (!%p187_p2)  ;;  %vm323_vm2 = vcmask (!%p187_p2), 523264   ;;  %vm397_vm3 = vcmask (!%p187_p2), 130048  }
   0x8   : > { %511 = vmatpush3.bf16.msra.mxu0 (!%p187_p2), %v510_v4  ;;  %v519_v13 = vpack.c.bf16 (!%p187_p2), %v311_v11, %v310_v10  ;;  %v313_v16 = vld [vmem:[%s644_s3 + $0x28] sm:$0xff] (!%p187_p2)  ;;  %v314_v18 = vld [vmem:[%s644_s3 + $0x30] sm:$0xff] (!%p187_p2)  ;;  %v315_v19 = vld [vmem:[%s644_s3 + $0x38] sm:$0xff] (!%p187_p2) }
   0x9   : > { %512 = vmatprep.subr.bf16.mxu0 (!%p187_p2), %v546_v3  ;;  %517 = vmatpush3.bf16.msra.mxu1 (!%p187_p2), %v516_v9  ;;  %v522_v17 = vpack.c.bf16 (!%p187_p2), %v313_v16, %v312_v15  ;;  %v525_v20 = vpack.c.bf16 (!%p187_p2), %v315_v19, %v314_v18  ;;  %v459_v21 = vld [vmem:[%s643_s2] ss:$0 sm:$0xff] (!%p187_p2) }
   0xa   : > { %518 = vmatprep.subr.bf16.mxu1 (!%p187_p2), %v546_v3  ;;  %v461_v27 = vld [vmem:[%s645_s4] ss:$0 sm:$0xff] (!%p187_p2) }
   0xc   : > { %514 = vmatpush3.bf16.msra.mxu0 (!%p187_p2), %v513_v12 }
   0xd   : > { %s648_s19 = smov (!%p212_p3, %s452_s19), 1  ;;  %520 = vmatpush3.bf16.msra.mxu1 %v519_v13 }
   0xe   : > { %s457_s11 = sshll.u32 %s648_s19, 3  ;;  %521 = vmatprep.subr.bf16.mxu1 %v546_v3 }
   0xf   : > { %s215_s14 = scalar_lea.vmem %s641_s0, %s457_s11  ;;  %s219_s30 = scalar_lea.vmem %s646_s5, %s457_s11 }
  0x10   : > { %v220_v14 = vld [vmem:[%s215_s14] sm:$0xff] }
  0x11   : > { %488 = vmatmul.mubr.msk.f32.vlgmr.msra.gmra.mrb[0].mxu0 %vm232_vm1, %v220_v14  ;;  %523 = vmatpush3.bf16.msra.mxu1 %v522_v17 }
  0x12   : > { %524 = vmatprep.subr.bf16.mxu1 %v546_v3 }
  0x15   : > { %526 = vmatpush3.bf16.msra.mxu1 %v525_v20 }
  0xe4   : > { %v302_v22 = vpop.f32.mrb[0].mxu0 }
  0xe5   : > { %v303_v23 = vadd.f32 %v459_v21, %v302_v22  ;;  %v489_v24 = vpop.f32.mrb[1].mxu0 }
  0xe7   : > { %v306_v25 = vmul.f32 0.2, %v303_v23 }
  0xe9   : > { %v307_v26 = vmax.f32 %v303_v23, %v306_v25 }
  0xeb   : > { %507 = vmatmul.mubr.msk.f32.vlgmr.msra.gmra.mrb[0].mxu1 %vm323_vm2, %v307_v26 }
 0x1be   : > { %v393_v28 = vpop.f32.mrb[0].mxu1 }
 0x1bf   : > { %v394_v29 = vadd.f32 %v461_v27, %v393_v28  ;;  %v508_v30 = vpop.f32.mrb[1].mxu1 }
 0x1c1   : > { %398 = vst.msk [vmem:[%s219_s30] sm:$0xff] %vm397_vm3, %v394_v29 }
 0x1c2 PF: > { %s15_s18 = sadd.s32 1, %s544_s18  }
 0x1c3   : > { %p12_p4 = scmp.ge.s32.totalorder %s15_s18, 4  }
 0x1c5   :  { %14 = sbr.rel (!%p12_p4) target bundleno = 1 (0x1), region = 70 }

</bundles_post_ra>
